<compile_context>
chip_gen: v7x
topology: tpu7x:2x2x1
jax: 0.10.0
libtpu: 0.0.40
codegen_flags: <defaults>
</compile_context>

<pallas_src>
import functools
import math

import jax
import jax.numpy as jnp
import numpy as np
from jax.experimental import pallas as pl
from jax.experimental.pallas import tpu as pltpu


def _round_up(v, m):
    return ((v + m - 1) // m) * m


# ---------------------------------------------------------------------------
# Pass 1 (optional): x_bf16 = (x / clip(alpha, 1e-5)).astype(bf16)
# Only emitted when x is re-streamed for >= 2 N-tiles by the matmul pass.
# ---------------------------------------------------------------------------
def _prescale_kernel(x_ref, alpha_ref, o_ref):
    a = jnp.maximum(alpha_ref[...], 1e-5)
    o_ref[...] = (x_ref[...] / a).astype(o_ref.dtype)


def _prescale_x(x2, alpha2, tm):
    Mp, K = x2.shape
    return pl.pallas_call(
        _prescale_kernel,
        out_shape=jax.ShapeDtypeStruct((Mp, K), jnp.bfloat16),
        grid_spec=pltpu.PrefetchScalarGridSpec(
            num_scalar_prefetch=0,
            grid=(Mp // tm,),
            in_specs=[pl.BlockSpec((tm, K), lambda i: (i, 0)),
                      pl.BlockSpec((1, K), lambda i: (0, 0))],
            out_specs=pl.BlockSpec((tm, K), lambda i: (i, 0)),
        ),
        compiler_params=pltpu.CompilerParams(dimension_semantics=("parallel",)),
        cost_estimate=pl.CostEstimate(
            flops=Mp * K, transcendentals=0,
            bytes_accessed=Mp * K * 4 + Mp * K * 2 + K * 4),
    )(x2, alpha2)


# ---------------------------------------------------------------------------
# Pass 2: fused per-N-tile weight fake-quant (hoisted) + tiled MXU matmul.
# grid = (j: N-tiles [outer, "parallel"], i: M-tiles [inner, "arbitrary"]).
# ---------------------------------------------------------------------------
def _teq_matmul_kernel(x_ref, alpha_ref, bias_ref, w_hbm, o_ref,
                       wq_ref, w_slab, dma_sem,
                       *, num_bits, group, scheme, tn, slab, x_prescaled):
    j = pl.program_id(0)          # N-tile index (split across TensorCores)
    i = pl.program_id(1)          # M-tile index (sequential per core -> hoist is valid)

    # ---- once per N-tile: TEQ weight scaling + fake (de)quant, slab by slab, into a
    #      persistent bf16 (K, tn) scratch that is reused by every M-tile. ----
    @pl.when(i == 0)
    def _():
        alpha = jnp.maximum(alpha_ref[...], 1e-5)          # (1, K)
        for s in range(tn // slab):                        # static slabs bound temporaries
            row0 = pl.multiple_of(j * tn + s * slab, slab)
            cp = pltpu.make_async_copy(w_hbm.at[pl.ds(row0, slab), :],
                                       w_slab, dma_sem.at[0])
            cp.start()
            cp.wait()
            w = w_slab[...] * alpha                        # (slab, K) f32
            K = w.shape[1]
            wg = w if group == K else w.reshape(slab, K // group, group)
            if scheme == "sym":
                maxq = float(2 ** (num_bits - 1) - 1)
                minq = float(-(2 ** (num_bits - 1)))
                wmax = jnp.max(jnp.abs(wg), axis=-1, keepdims=True)
                wmax = jnp.where(wmax == 0.0, 1.0, wmax)
                scale = wmax / maxq
                wq = scale * jnp.clip(jnp.round(wg / scale), minq, maxq)
            else:                                          # "asym" (default)
                maxq = float(2 ** num_bits - 1)
                wmin = jnp.minimum(jnp.min(wg, axis=-1, keepdims=True), 0.0)
                wmax = jnp.maximum(jnp.max(wg, axis=-1, keepdims=True), 0.0)
                both_zero = jnp.logical_and(wmin == 0.0, wmax == 0.0)
                wmin = jnp.where(both_zero, -1.0, wmin)
                wmax = jnp.where(both_zero, 1.0, wmax)
                scale = (wmax - wmin) / maxq
                zp = jnp.round(-wmin / scale)
                q = jnp.clip(jnp.round(wg / scale) + zp, 0.0, maxq)
                wq = scale * (q - zp)
            if group != K:
                wq = wq.reshape(slab, K)
            # Store transposed so the hot loop is a canonical (tm,K)x(K,tn) matmul.
            # TODO(synk): keep wq in f32 when num_bits >= 8 (bf16 rounding ~ quant step).
            wq_ref[:, s * slab:(s + 1) * slab] = wq.T.astype(wq_ref.dtype)

    # ---- per M-tile: bf16 MXU matmul with f32 accumulation ----
    if x_prescaled:
        x = x_ref[...]                                     # already (x / alpha) in bf16
    else:
        a = jnp.maximum(alpha_ref[...], 1e-5)
        x = (x_ref[...] / a).astype(jnp.bfloat16)
    acc = jnp.dot(x, wq_ref[...], preferred_element_type=jnp.float32)
    o_ref[...] = (acc + bias_ref[...]).astype(o_ref.dtype)


def teq_linear_fake_quant(x, weight, bias, alpha, *,
                          num_bits=4, group_size=-1, scheme="asym",
                          tm=256, tn=1024):
    """x: (..., K); weight: (N, K); bias: (N,) or None; alpha: (K,) -> (..., N)."""
    orig_lead = x.shape[:-1]
    K = x.shape[-1]
    N = weight.shape[0]
    assert weight.shape[1] == K
    M = int(math.prod(orig_lead)) if orig_lead else 1
    if bias is None:
        bias = jnp.zeros((N,), x.dtype)
    weight = weight.astype(jnp.float32)

    # Effective group (quant_tensor: per-row when group_size==-1 or K < group_size).
    g = K if (group_size == -1 or K < group_size) else group_size
    assert K % g == 0, "in_features must be divisible by group_size"

    # ---- generation-aware VMEM budget (v5e/v6e: 128 MiB, v7x: 64 MiB per core) ----
    try:
        vmem_cap = int(getattr(pltpu.get_tpu_info(), "vmem_capacity_bytes",
                               64 * 1024 * 1024))
    except Exception:
        vmem_cap = 64 * 1024 * 1024
    vmem_budget = vmem_cap - 16 * 1024 * 1024       # headroom for Mosaic internal scratch

    # ---- tile selection: lane aligned, megacore aware, VMEM fitting ----
    tm_eff = max(16, min(_round_up(tm, 16), _round_up(M, 16)))
    n128 = _round_up(N, 128)
    tn_eff = min(max(128, _round_up(tn, 128)), n128)
    if n128 >= 256:   # keep >= 2 N-tiles so the "parallel" axis spans both v7x cores
        tn_eff = min(tn_eff, max(128, (n128 // 2) // 128 * 128))

    def _slab(tn_):
        s = math.gcd(tn_, 256)
        return 128 if s * K * 4 > (8 << 20) else s

    def _vmem_needed(tm_, tn_, x_bytes):
        s = _slab(tn_)
        return (K * tn_ * 2                 # resident bf16 (K, tn) quantized weight
                + 3 * s * K * 4             # f32 weight slab + quant temporaries
                + 2 * tm_ * K * x_bytes     # double-buffered x blocks
                + 2 * tm_ * tn_ * 4         # double-buffered f32 out blocks
                + 2 * tn_ * 4 + 2 * K * 4)  # bias + alpha blocks

    # Shrink tn first, then tm (conservative f32 x bytes while sizing).
    while tn_eff > 128 and _vmem_needed(tm_eff, tn_eff, 4) > vmem_budget:
        tn_eff -= 128
    while tm_eff > 16 and _vmem_needed(tm_eff, tn_eff, 4) > vmem_budget:
        tm_eff = max(16, _round_up(tm_eff // 2, 16))
    # TODO(synk): tile K with an f32 accumulator when even a (16, K) block cannot fit VMEM.

    slab = _slab(tn_eff)
    Mp = _round_up(M, tm_eff)
    Np = _round_up(N, tn_eff)
    n_tiles = Np // tn_eff
    m_tiles = Mp // tm_eff
    prescale = n_tiles >= 2      # x is re-streamed per N-tile -> pre-scale to bf16 once

    # ---- pad (instead of gcd-collapsing tiles) and flatten ----
    x2 = x.reshape(M, K)
    if Mp != M:
        x2 = jnp.pad(x2, ((0, Mp - M), (0, 0)))
    w2 = weight if Np == N else jnp.pad(weight, ((0, Np - N), (0, 0)))
    b2 = bias if Np == N else jnp.pad(bias, ((0, Np - N),))
    alpha2 = alpha.reshape(1, K)
    bias2 = b2.reshape(1, Np)

    x_in = _prescale_x(x2, alpha2, tm_eff) if prescale else x2
    x_bytes = 2 if prescale else 4

    kernel = functools.partial(_teq_matmul_kernel,
                               num_bits=num_bits, group=g, scheme=scheme,
                               tn=tn_eff, slab=slab, x_prescaled=prescale)

    vmem_needed = _vmem_needed(tm_eff, tn_eff, x_bytes)
    vmem_limit = int(min(vmem_cap, max(vmem_needed + 14 * 1024 * 1024,
                                       32 * 1024 * 1024)))

    cost = pl.CostEstimate(
        flops=2 * Mp * Np * K,
        transcendentals=0,
        bytes_accessed=(Mp * K * x_bytes * n_tiles   # x streamed once per N-tile
                        + Np * K * 4                 # raw f32 weight read once
                        + Np * 4 + K * 4             # bias + alpha
                        + Mp * Np * 4),              # output
    )

    out = pl.pallas_call(
        kernel,
        out_shape=jax.ShapeDtypeStruct((Mp, Np), x.dtype),
        grid_spec=pltpu.PrefetchScalarGridSpec(
            num_scalar_prefetch=0,
            grid=(n_tiles, m_tiles),   # N outer ("parallel"), M inner ("arbitrary")
            in_specs=[
                pl.BlockSpec((tm_eff, K), lambda j, i: (i, 0)),   # x M-tile
                pl.BlockSpec((1, K), lambda j, i: (0, 0)),        # alpha (grid-invariant)
                pl.BlockSpec((1, tn_eff), lambda j, i: (0, j)),   # bias N-tile
                pl.BlockSpec(memory_space=pl.ANY),                # raw f32 weight in HBM
            ],
            out_specs=pl.BlockSpec((tm_eff, tn_eff), lambda j, i: (i, j)),
            scratch_shapes=[
                pltpu.VMEM((K, tn_eff), jnp.bfloat16),   # hoisted quantized weight (K, tn)
                pltpu.VMEM((slab, K), jnp.float32),      # one f32 weight slab at a time
                pltpu.SemaphoreType.DMA((1,)),
            ],
        ),
        compiler_params=pltpu.CompilerParams(
            dimension_semantics=("parallel", "arbitrary"),
            vmem_limit_bytes=vmem_limit,
        ),
        cost_estimate=cost,
    )(x_in, alpha2, bias2, w2)

    out = out[:M, :N]
    return out.reshape(orig_lead + (N,))


# ---------------------------------------------------------------------------
# Pure-JAX f32 reference mirroring the PyTorch module.
# ---------------------------------------------------------------------------
def _reference(x, weight, bias, alpha, num_bits, group_size, scheme):
    K = x.shape[-1]
    N = weight.shape[0]
    a = jnp.maximum(alpha, 1e-5)
    xs = x / a
    w = weight * a[None, :]
    g = K if (group_size == -1 or K < group_size) else group_size
    wg = w.reshape(N, K // g, g)
    if scheme == "sym":
        maxq = float(2 ** (num_bits - 1) - 1)
        minq = float(-(2 ** (num_bits - 1)))
        wmax = jnp.max(jnp.abs(wg), -1, keepdims=True)
        wmax = jnp.where(wmax == 0.0, 1.0, wmax)
        scale = wmax / maxq
        wq = (scale * jnp.clip(jnp.round(wg / scale), minq, maxq)).reshape(N, K)
    else:
        maxq = float(2 ** num_bits - 1)
        wmin = jnp.minimum(jnp.min(wg, -1, keepdims=True), 0.0)
        wmax = jnp.maximum(jnp.max(wg, -1, keepdims=True), 0.0)
        both = jnp.logical_and(wmin == 0.0, wmax == 0.0)
        wmin = jnp.where(both, -1.0, wmin)
        wmax = jnp.where(both, 1.0, wmax)
        scale = (wmax - wmin) / maxq
        zp = jnp.round(-wmin / scale)
        q = jnp.clip(jnp.round(wg / scale) + zp, 0.0, maxq)
        wq = (scale * (q - zp)).reshape(N, K)
    return jnp.einsum("...k,nk->...n", xs, wq) + bias


if __name__ == "__main__":
    def run_case(batch, seq, K, N, num_bits, group_size, scheme, key):
        kx, kw, kb, ka = jax.random.split(key, 4)
        x = jax.random.normal(kx, (batch, seq, K), dtype=jnp.float32)
        weight = jax.random.normal(kw, (N, K), dtype=jnp.float32) * 0.1
        bias = jax.random.normal(kb, (N,), dtype=jnp.float32) * 0.01
        alpha = jax.random.uniform(ka, (K,), dtype=jnp.float32, minval=0.0, maxval=2.0)
        out = teq_linear_fake_quant(x, weight, bias, alpha,
                                    num_bits=num_bits, group_size=group_size,
                                    scheme=scheme)
        out = jax.block_until_ready(out)
        ref = _reference(x, weight, bias, alpha, num_bits, group_size, scheme)
        np.testing.assert_allclose(np.asarray(out), np.asarray(ref),
                                   rtol=2e-2, atol=2e-2)

    key = jax.random.PRNGKey(0)
    k1, k2 = jax.random.split(key)
    # Case A: two N-tiles -> prescaled bf16 x path + megacore-split N axis, asym 4-bit.
    run_case(batch=2, seq=8, K=128, N=256, num_bits=4, group_size=-1, scheme="asym",
             key=k1)
    # Case B: single N-tile -> in-kernel scaling path, M padding (24 -> 32), sym, groups.
    run_case(batch=3, seq=8, K=128, N=128, num_bits=4, group_size=64, scheme="sym",
             key=k2)

    print("KERNEL_OK")
</pallas_src>

<mosaic_0001>
module attributes {stable_mosaic.version = 11 : i64} {
  func.func @_prescale_kernel(%arg0: i32, %arg1: memref<16x128xf32, #tpu.memory_space<vmem>>, %arg2: memref<1x128xf32, #tpu.memory_space<vmem>>, %arg3: memref<16x128xbf16, #tpu.memory_space<vmem>>) attributes {dimension_semantics = [#tpu.dimension_semantics<parallel>], iteration_bounds = array<i64: 1>, scalar_prefetch = 0 : i64, scratch_operands = 0 : i64, tpu.core_type = #tpu.core_type<tc>, window_params = [{transform_indices = @transform_0, window_bounds = array<i64: 16, 128>}, {pipeline_mode = #tpu.pipeline_mode<synchronous>, transform_indices = @transform_1, window_bounds = array<i64: 1, 128>}, {transform_indices = @transform_2, window_bounds = array<i64: 16, 128>}]} {
    %c0 = arith.constant 0 : index
    %c0_0 = arith.constant 0 : index
    %0 = vector.load %arg2[%c0, %c0_0] : memref<1x128xf32, #tpu.memory_space<vmem>>, vector<1x128xf32>
    %cst = arith.constant 9.99999974E-6 : f32
    %1 = vector.broadcast %cst : f32 to vector<1x128xf32>
    %2 = arith.maximumf %0, %1 : vector<1x128xf32>
    %c0_1 = arith.constant 0 : index
    %c0_2 = arith.constant 0 : index
    %3 = vector.load %arg1[%c0_1, %c0_2] : memref<16x128xf32, #tpu.memory_space<vmem>>, vector<16x128xf32>
    %4 = vector.broadcast %2 : vector<1x128xf32> to vector<16x128xf32>
    %5 = arith.divf %3, %4 : vector<16x128xf32>
    %6 = arith.truncf %5 : vector<16x128xf32> to vector<16x128xbf16>
    %c0_3 = arith.constant 0 : index
    %c0_4 = arith.constant 0 : index
    %7 = vector.load %arg3[%c0_3, %c0_4] : memref<16x128xbf16, #tpu.memory_space<vmem>>, vector<16x128xbf16>
    tpu.vector_store %arg3[%c0_3, %c0_4], %6 {strides = array<i32>} : memref<16x128xbf16, #tpu.memory_space<vmem>>, vector<16x128xbf16>,
    return
  }
  func.func @transform_0(%arg0: i32) -> (i32, i32) {
    %c0_i32 = arith.constant 0 : i32
    %c0_i32_0 = arith.constant 0 : i32
    return %arg0, %c0_i32 : i32, i32
  }
  func.func @transform_1(%arg0: i32) -> (i32, i32) {
    %c0_i32 = arith.constant 0 : i32
    %c0_i32_0 = arith.constant 0 : i32
    %c0_i32_1 = arith.constant 0 : i32
    return %c0_i32, %c0_i32_0 : i32, i32
  }
  func.func @transform_2(%arg0: i32) -> (i32, i32) {
    %c0_i32 = arith.constant 0 : i32
    %c0_i32_0 = arith.constant 0 : i32
    return %arg0, %c0_i32 : i32, i32
  }
}

</mosaic_0001>

<bundles_post_ra>
// kernel: tpu_custom_call.1
= control target key start
LH: loop header
LB: loop body
LE: loop exit
PB: predicated region body
PF: predicated region fallthrough
CT: control target
= control target key end

     0   :  { %7 = vsyncpa [#allocation3], 0  ;;  %s179_s0 = inlined_call_operand.hbm [shape: f32[16,128], index: 0, kind: input, shape index: {}]   ;;  %s180_s1 = inlined_call_operand.vmem [shape: f32[1,128], index: 1, kind: input, shape index: {}]   ;;  %s181_s2 = inlined_call_operand.hbm [shape: bf16[16,128], index: 2, kind: output, shape index: {}]  }
   0x1   :  { %8 = vsyncpa [#allocation4], 0  ;;  %s131_s9 = smov [#allocation2]   ;;  %s83_s13 = scalar_lea.hbm %s179_s0, 256 }
   0x2   :  { %s14_s10 = sshll.u32 %s131_s9, 4  ;;  %p84_p0 = scmp.ne.s32.totalorder %s179_s0, %s83_s13  ;;  %s15_s10 = int_to_ptr.vmem [resolvable:$true] %s14_s10 }
   0x3   :  { %p87_p1 = scmp.lt.u32.totalorder %s83_s13, %s179_s0 }
   0x5   :  { %p89_p2 = pnand %p87_p1, %p84_p0 }
   0x7   :  { %92 = shalt.err (!%p89_p2)
}
   0x8   :  { %s93_s18 = scalar_lea.vmem %s15_s10, 256  ;;  %p98_p4 = scmp.lt.s32.totalorder %s15_s10, %s15_s10 }
   0x9   :  { %p94_p3 = scmp.ne.s32.totalorder %s15_s10, %s93_s18  ;;  %p99_p5 = scmp.lt.s32.totalorder %s93_s18, %s93_s18 }
   0xb   :  { %p100_p6 = por %p99_p5, %p98_p4 }
   0xd   :  { %p101_p7 = pnand %p100_p6, %p94_p3 }
   0xf   :  { %104 = shalt.err (!%p101_p7)
}
  0x10   :  { %s132_s19 = smov 128   ;;  %s133_s20 = smov 8  }
  0x11   :  { %20 = dma.hbm_to_vmem [thread:$0]  %s179_s0, 256, %s15_s10, [#allocation3], %s132_s19, %s132_s19, %s133_s20  }
  0x12   :  { %127 = dma.done.wait [#allocation3], 256  }
  0x13   :  { %128 = vsyncadd [#allocation3], 4294967040  ;;  %v31_v0 = vlaneseq  ;;  %v26_v3 = vld [vmem:[%s180_s1] sm:$0x1]  ;;  %v29_v7 = vld [vmem:[#allocation2 + $0x8] sm:$0xff]  ;;  %s134_s25 = smov [#allocation5]  }
  0x14   :  { %v27_v4 = vmax.f32 %v26_v3, 1e-05  ;;  %v28_v6 = vld [vmem:[#allocation2] sm:$0xff]  ;;  %s54_s26 = sshll.u32 %s134_s25, 4  ;;  %s55_s26 = int_to_ptr.vmem [resolvable:$true] %s54_s26 }
  0x15   :  { %v32_v1 = vshrl.u32 %v31_v0, 7  ;;  %s105_s0 = scalar_lea.vmem %s55_s26, 128  ;;  %p110_p9 = scmp.lt.s32.totalorder %s55_s26, %s55_s26 }
  0x16   :  { %p106_p8 = scmp.ne.s32.totalorder %s55_s26, %s105_s0  ;;  %p111_p10 = scmp.lt.s32.totalorder %s105_s0, %s105_s0 }
  0x17   :  { %v33_v2 = vsub.s32 0, %v32_v1 }
  0x18   :  { %p112_p11 = por %p111_p10, %p110_p9 }
  0x19   :  { %v34_v5 = vrot.slane %v27_v4, %v33_v2 }
  0x1a   :  { %p113_p12 = pnand %p112_p11, %p106_p8 }
  0x1b   :  { %81 = vrcp.f32 %v34_v5 }
  0x25   :  { %v82_v8 = vpop.eup %81 }
  0x26   :  { %v37_v9 = vmul.f32 %v82_v8, %v28_v6  ;;  %v38_v10 = vmul.f32 %v82_v8, %v29_v7 }
  0x28   :  { %v73_v11 = vpack.c.bf16 %v38_v10, %v37_v9 }
  0x2a   :  { %74 = vst [vmem:[#allocation5] sm:$0xff] %v73_v11  }
  0x2b   :  { %116 = shalt.err (!%p113_p12)
}
  0x2c   :  { %s117_s28 = scalar_lea.hbm %s181_s2, 128 }
  0x2d   :  { %p118_p13 = scmp.ne.s32.totalorder %s181_s2, %s117_s28  ;;  %p121_p0 = scmp.lt.u32.totalorder %s117_s28, %s181_s2 }
  0x2f   :  { %p123_p1 = pnand %p121_p0, %p118_p13 }
  0x31   :  { %126 = shalt.err (!%p123_p1)
}
  0x32   :  { %s135_s5 = smov 64   ;;  %s136_s6 = smov 4  }
  0x33   :  { %60 = dma.vmem_to_hbm [thread:$0]  %s55_s26, 128, %s181_s2, [#allocation4], %s135_s5, %s135_s5, %s136_s6  }
  0x34   :  { %129 = dma.done.wait [#allocation4], 128  }
  0x35   :  { %130 = vsyncadd [#allocation4], 4294967168 }
  0x36   :  { %64 = vsyncpa [#allocation3], 1 }
  0x37   :  { %65 = vsyncpa [#allocation4], 1 }

</bundles_post_ra>
